<compile_context>
chip_gen: v7x
topology: tpu7x:2x2x1
jax: 0.10.0
libtpu: 0.0.40
codegen_flags: <defaults>
</compile_context>

<pallas_src>
import jax
import jax.numpy as jnp
from jax import lax
from jax.experimental import pallas as pl
from jax.experimental.pallas import tpu as pltpu


def unitnorm_kernel(x_ref, noise_ref, o_ref):
    x = x_ref[...]                                           # (tm, Dp) f32

    # valid_index = (x != 0).sum(1, keepdims=True) > 0  (padded cols are 0 -> ignored)
    valid = jnp.any(x != 0.0, axis=1, keepdims=True)         # (tm, 1) bool

    # All-zero rows are replaced with the VMEM-resident standard-normal tile.
    v = jnp.where(valid, x, noise_ref[...])

    # L2 normalization along dim 1. No epsilon, matching PyTorch's formula
    # (a row of pure denormals can still overflow to inf/NaN, as in torch).
    sumsq = jnp.sum(v * v, axis=1, keepdims=True)             # (tm, 1)
    o_ref[...] = (v * lax.rsqrt(sumsq)).astype(o_ref.dtype)


def _pick_tm(N, Dp, itemsize=4, target_bytes=4 << 20):
    """Row tile: multiple of 8, divides N, block ~target_bytes, and (when
    possible) >= 2 grid steps so v7x's two TensorCores and the DMA double
    buffer both have work."""
    row_bytes = max(1, Dp * itemsize)
    max_rows = max(8, target_bytes // row_bytes)
    if N >= 16:
        max_rows = min(max_rows, N // 2)      # guarantee grid length >= 2
    max_rows = max(8, (max_rows // 8) * 8)
    best = None
    for tm in range(8, min(N, max_rows) + 1, 8):
        if N % tm == 0:
            best = tm
    if best is not None:
        return best
    # No multiple-of-8 divisor of N within budget: full-extent row block is
    # always legal. TODO(synk): for huge N*D with no small divisor, split D
    # across a second grid axis (two-pass sum-of-squares then scale).
    return N


def unit_norm(vectors, seed=0, tm=None):
    """Pallas UnitNorm. vectors: f32[N, D]; normalization over D (PyTorch dim=1)."""
    N, D = vectors.shape

    # Lane-dense layout: pad feature dim to a multiple of 128 (zeros in the pad
    # don't change the any()/sum-of-squares reductions; padded noise is zeroed
    # so all-zero rows normalize over the real D only).
    Dp = ((D + 127) // 128) * 128
    if tm is None:
        tm = _pick_tm(N, Dp, itemsize=vectors.dtype.itemsize)
    assert N % tm == 0, "tm must evenly tile N"
    assert tm % 8 == 0 or tm == N, "tm must be a multiple of 8 (f32 sublane tiling)"

    x = vectors
    if Dp != D:
        x = jnp.pad(x, ((0, 0), (0, Dp - D)))

    # randn_like(x) replacement noise: a single (tm, Dp) tile, generated outside
    # the kernel (same distribution as torch.randn, different RNG stream) and
    # kept VMEM-resident via a constant index_map (DMA'd once, never re-fetched).
    noise = jax.random.normal(jax.random.PRNGKey(seed), (tm, D), dtype=vectors.dtype)
    if Dp != D:
        noise = jnp.pad(noise, ((0, 0), (0, Dp - D)))

    grid = (N // tm,)
    out = pl.pallas_call(
        unitnorm_kernel,
        out_shape=jax.ShapeDtypeStruct((N, Dp), vectors.dtype),
        grid=grid,
        in_specs=[
            pl.BlockSpec((tm, Dp), lambda i: (i, 0)),   # x: streamed row tiles
            pl.BlockSpec((tm, Dp), lambda i: (0, 0)),   # noise: constant block -> resident
        ],
        out_specs=pl.BlockSpec((tm, Dp), lambda i: (i, 0)),
        compiler_params=pltpu.CompilerParams(
            dimension_semantics=("parallel",),          # order-free row tiles
            vmem_limit_bytes=48 * 1024 * 1024,          # <= ~48 MiB (v7x-safe)
        ),
    )(x, noise)

    if Dp != D:
        out = out[:, :D]
    return out


if __name__ == "__main__":
    key = jax.random.PRNGKey(0)

    # Primary run: lane-dense D (multiple of 128), multiple row tiles.
    N, D = 64, 128
    x = jax.random.normal(key, (N, D), dtype=jnp.float32)
    # Make two rows all-zero to exercise the randn replacement branch.
    x = x.at[3, :].set(0.0)
    x = x.at[40, :].set(0.0)

    out = jax.block_until_ready(unit_norm(x, seed=1234))
    assert out.shape == (N, D)
    row_norms = jnp.sqrt(jnp.sum(out * out, axis=1))
    assert bool(jnp.all(jnp.abs(row_norms - 1.0) < 1e-4))
    ref = x / jnp.sqrt(jnp.sum(x * x, axis=1, keepdims=True))
    nonzero_rows = jnp.any(x != 0.0, axis=1)
    assert bool(jnp.all(jnp.where(nonzero_rows[:, None],
                                  jnp.abs(out - ref) < 1e-5, True)))

    # Secondary sanity run: small odd D exercises the lane-padding path.
    x2 = jax.random.normal(jax.random.PRNGKey(1), (16, 32), dtype=jnp.float32)
    x2 = x2.at[5, :].set(0.0)
    out2 = jax.block_until_ready(unit_norm(x2, seed=7))
    assert out2.shape == (16, 32)
    rn2 = jnp.sqrt(jnp.sum(out2 * out2, axis=1))
    assert bool(jnp.all(jnp.abs(rn2 - 1.0) < 1e-4))
    ref2 = x2 / jnp.sqrt(jnp.sum(x2 * x2, axis=1, keepdims=True))
    nz2 = jnp.any(x2 != 0.0, axis=1)
    assert bool(jnp.all(jnp.where(nz2[:, None],
                                  jnp.abs(out2 - ref2) < 1e-5, True)))

    print("KERNEL_OK")
</pallas_src>

<mosaic_0001>
module attributes {stable_mosaic.version = 11 : i64} {
  func.func @unitnorm_kernel(%arg0: i32, %arg1: memref<32x128xf32, #tpu.memory_space<vmem>>, %arg2: memref<32x128xf32, #tpu.memory_space<vmem>>, %arg3: memref<32x128xf32, #tpu.memory_space<vmem>>) attributes {dimension_semantics = [#tpu.dimension_semantics<parallel>], iteration_bounds = array<i64: 2>, scalar_prefetch = 0 : i64, scratch_operands = 0 : i64, tpu.core_type = #tpu.core_type<tc>, window_params = [{transform_indices = @transform_0, window_bounds = array<i64: 32, 128>}, {pipeline_mode = #tpu.pipeline_mode<synchronous>, transform_indices = @transform_1, window_bounds = array<i64: 32, 128>}, {transform_indices = @transform_2, window_bounds = array<i64: 32, 128>}]} {
    %c0 = arith.constant 0 : index
    %c0_0 = arith.constant 0 : index
    %0 = vector.load %arg1[%c0, %c0_0] : memref<32x128xf32, #tpu.memory_space<vmem>>, vector<32x128xf32>
    %cst = arith.constant 0.000000e+00 : f32
    %1 = vector.broadcast %cst : f32 to vector<32x128xf32>
    %2 = arith.cmpf one, %0, %1 : vector<32x128xf32>
    %cst_1 = arith.constant 1.000000e+00 : f32
    %cst_2 = arith.constant 0.000000e+00 : f32
    %3 = vector.broadcast %cst_1 : f32 to vector<32x128xf32>
    %4 = vector.broadcast %cst_2 : f32 to vector<32x128xf32>
    %5 = arith.select %2, %3, %4 : vector<32x128xi1>, vector<32x128xf32>
    %cst_3 = arith.constant dense<0xFF800000> : vector<32xf32>
    %6 = vector.multi_reduction <maximumf>, %5, %cst_3 [1] : vector<32x128xf32> to vector<32xf32>
    %cst_4 = arith.constant 0.000000e+00 : f32
    %7 = vector.broadcast %cst_4 : f32 to vector<32xf32>
    %8 = arith.cmpf ogt, %6, %7 : vector<32xf32>
    %9 = vector.shape_cast %8 : vector<32xi1> to vector<32x1xi1>
    %c0_5 = arith.constant 0 : index
    %c0_6 = arith.constant 0 : index
    %10 = vector.load %arg2[%c0_5, %c0_6] : memref<32x128xf32, #tpu.memory_space<vmem>>, vector<32x128xf32>
    %11 = vector.shape_cast %9 : vector<32x1xi1> to vector<32x1xi1>
    %12 = vector.broadcast %11 : vector<32x1xi1> to vector<32x128xi1>
    %13 = arith.select %12, %0, %10 : vector<32x128xi1>, vector<32x128xf32>
    %14 = arith.mulf %13, %13 : vector<32x128xf32>
    %cst_7 = arith.constant dense<0.000000e+00> : vector<32xf32>
    %15 = vector.multi_reduction <add>, %14, %cst_7 [1] : vector<32x128xf32> to vector<32xf32>
    %16 = vector.shape_cast %15 : vector<32xf32> to vector<32x1xf32>
    %17 = math.rsqrt %16 : vector<32x1xf32>
    %18 = vector.broadcast %17 : vector<32x1xf32> to vector<32x128xf32>
    %19 = arith.mulf %13, %18 : vector<32x128xf32>
    %c0_8 = arith.constant 0 : index
    %c0_9 = arith.constant 0 : index
    %20 = vector.load %arg3[%c0_8, %c0_9] : memref<32x128xf32, #tpu.memory_space<vmem>>, vector<32x128xf32>
    tpu.vector_store %arg3[%c0_8, %c0_9], %19 {strides = array<i32>} : memref<32x128xf32, #tpu.memory_space<vmem>>, vector<32x128xf32>,
    return
  }
  func.func @transform_0(%arg0: i32) -> (i32, i32) {
    %c0_i32 = arith.constant 0 : i32
    %c0_i32_0 = arith.constant 0 : i32
    return %arg0, %c0_i32 : i32, i32
  }
  func.func @transform_1(%arg0: i32) -> (i32, i32) {
    %c0_i32 = arith.constant 0 : i32
    %c0_i32_0 = arith.constant 0 : i32
    %c0_i32_1 = arith.constant 0 : i32
    return %c0_i32, %c0_i32_0 : i32, i32
  }
  func.func @transform_2(%arg0: i32) -> (i32, i32) {
    %c0_i32 = arith.constant 0 : i32
    %c0_i32_0 = arith.constant 0 : i32
    return %arg0, %c0_i32 : i32, i32
  }
}

</mosaic_0001>

<bundles_post_ra>
// kernel: tpu_custom_call.1
= control target key start
LH: loop header
LB: loop body
LE: loop exit
PB: predicated region body
PF: predicated region fallthrough
CT: control target
= control target key end

     0   :  { %7 = vsyncpa [#allocation3], 0  ;;  %s792_s0 = inlined_call_operand.hbm [shape: f32[64,128], index: 0, kind: input, shape index: {}]   ;;  %s793_s1 = inlined_call_operand.hbm [shape: f32[32,128], index: 1, kind: input, shape index: {}]   ;;  %s794_s2 = inlined_call_operand.hbm [shape: f32[64,128], index: 2, kind: output, shape index: {}]  }
   0x1   :  { %9 = vsyncpa [#allocation3 + $0x1], 0 }
   0x2   :  { %10 = vsyncpa [#allocation6], 0 }
   0x3   :  { %11 = vsyncpa [#allocation4], 0 }
   0x4   :  { %13 = vsyncpa [#allocation4 + $0x1], 0  ;;  %s581_s9 = smov 0   ;;  %s583_s10 = smov 0  }
   0x5   :  { %s585_s11 = smov 0   ;;  %s587_s12 = smov 0  }
   0x6 LB: > { %s602_s13 = sadd.s32 4294967295, %s556_s12   ;;  %s340_s14 = sadd.s32 4294967294, %s556_s12   ;;  %s556_s12 = sphi %s587_s12, %s814_s12   ;;  %s552_s11 = sphi %s585_s11, %s813_s11   ;;  %s548_s10 = sphi %s583_s10, %s812_s10   ;;  %s544_s9 = sphi %s581_s9, %s811_s9  }
   0x7   : > { %p39_p0 = scmp.ne.s32.totalorder %s548_s10, %s544_s9  ;;  %p795_p1 = scmp.eq.s32.totalorder %s602_s13, 0 }
   0x8   : > { %p90_p3 = scmp.eq.s32.totalorder %s340_s14, 1  ;;  %p341_p5 = scmp.ge.s32.totalorder %s556_s12, 1 }
   0x9   : > { %p611_p4 = por %p795_p1, %p39_p0  ;;  %p97_p7 = scmp.lt.s32.totalorder %s556_s12, 3 }
   0xa   : > { %p616_p6 = por %p90_p3, %p39_p0  ;;  %s558_s18 = smov [#allocation5]  }
   0xb   : > { %s798_s15 = scalar_select %p611_p4, 1, 0 }
   0xc   : > { %s799_s16 = scalar_select %p616_p6, 1, 0 }
   0xd   : > { %p621_p8 = pnand %p341_p5, %p97_p7  ;;  %s109_s19 = sshll.u32 %s558_s18, 4  ;;  %s625_s19 = int_to_ptr.vmem [resolvable:$true] %s109_s19 }
   0xe   : > { %s637_s21 = sadd.s32 1, %s556_s12   ;;  %s26_s22 = sadd.s32 1, %s552_s11 }
   0xf   : > { %s800_s17 = scalar_select %p621_p8, 1, 0 }
  0x10   : > { %p366_p9 = pneg %p621_p8  ;;  %s23_s23 = ssub.s32 %s556_s12, %s637_s21 }
  0x11   : > { %s428_s26 = scalar_lea.hbm %s793_s1, 512 }
  0x12   : > { %p632_p11 = pnand %p366_p9, %p795_p1  ;;  %p429_p12 = scmp.ne.s32.totalorder %s793_s1, %s428_s26 }
  0x13   : > { %p435_p5 = scmp.lt.u32.totalorder %s428_s26, %s793_s1 }
  0x14   : > { %p430_p13 = pneg %p632_p11 }
  0x16   : > { %p431_p0 = pnand %p430_p13, %p429_p12 }
  0x18   : > { %p432_p3 = pneg %p431_p0 }
  0x1a   : > { %p437_p7 = pnand %p435_p5, %p432_p3 }
  0x1c   : > { %440 = shalt.err (!%p437_p7)
}
  0x1d   : > { %s441_s3 = scalar_lea.vmem %s625_s19, 512  ;;  %p449_p2 = scmp.lt.s32.totalorder %s625_s19, %s625_s19 }
  0x1e   : > { %p442_p9 = scmp.ne.s32.totalorder %s625_s19, %s441_s3  ;;  %p450_p6 = scmp.lt.s32.totalorder %s441_s3, %s441_s3 }
  0x20   : > { %p444_p10 = pnand %p442_p9, %p430_p13  ;;  %p451_p4 = por %p450_p6, %p449_p2 }
  0x22   : > { %p445_p1 = pneg %p444_p10 }
  0x24   : > { %p452_p8 = pnand %p451_p4, %p445_p1 }
  0x26   : > { %455 = shalt.err (!%p452_p8)
}
  0x27   : > { %s559_s4 = smov 128   ;;  %s560_s5 = smov 8  }
  0x28   : > { %369 = dma.hbm_to_vmem [thread:$0]  (!%p632_p11), %s793_s1, 512, %s625_s19, [#allocation6], %s559_s4, %s559_s4, %s560_s5  }
  0x29   : > { %p24_p1 = scmp.eq.s32.totalorder %s23_s23, 0  ;;  %p33_p2 = scmp.ne.s32.totalorder %s552_s11, %s548_s10 }
  0x2a   : > { %p34_p4 = scmp.eq.s32.totalorder %s556_s12, 0  ;;  %p379_p6 = scmp.lt.s32.totalorder %s556_s12, 2 }
  0x2b   : > { %s671_s8 = scalar_select %p24_p1, %s552_s11, %s26_s22  }
  0x2c   : > { %p35_p8 = por %p34_p4, %p33_p2  ;;  %p802_p10 = scmp.eq.s32.totalorder %s602_s13, 1 }
  0x2d   : > { %s123_s18 = sand.u32 1, %s552_s11   ;;  %s356_s20 = sshll.u32 %s556_s12, 9 }
  0x2e   : > { %p675_p12 = por %p802_p10, %p33_p2  ;;  %s344_s24 = sshll.u32 %s123_s18, 5 }
  0x2f   : > { %s684_s27 = scalar_lea.hbm %s792_s0, %s356_s20  ;;  %s127_s19 = scalar_lea.vmem [#allocation2], %s344_s24 }
  0x30   : > { %s134_s22 = sshll.u32 %s127_s19, 4  ;;  %p686_p11 = pnand %p379_p6, %p35_p8  ;;  %s690_s22 = int_to_ptr.vmem [resolvable:$true] %s134_s22 }
  0x31   : > { %s692_s28 = scalar_lea.sflag [#allocation3], %s123_s18  ;;  %s456_s29 = scalar_lea.hbm %s684_s27, 512 }
  0x32   : > { %p457_p13 = scmp.ne.s32.totalorder %s684_s27, %s456_s29  ;;  %p458_p0 = pneg %p686_p11 }
  0x33   : > { %s461_s6 = scalar_lea.hbm %s792_s0, 1024  ;;  %p462_p7 = scmp.lt.u32.totalorder %s684_s27, %s792_s0 }
  0x34   : > { %p459_p3 = pnand %p458_p0, %p457_p13  ;;  %p463_p9 = scmp.lt.u32.totalorder %s461_s6, %s456_s29 }
  0x35   : > { %p465_p2 = scmp.lt.u32.totalorder %s456_s29, %s684_s27 }
  0x36   : > { %p460_p5 = pneg %p459_p3  ;;  %p464_p1 = por %p463_p9, %p462_p7 }
  0x38   : > { %p466_p4 = por %p465_p2, %p464_p1 }
  0x3a   : > { %p467_p6 = pnand %p466_p4, %p460_p5 }
  0x3c   : > { %470 = shalt.err (!%p467_p6)
}
  0x3d   : > { %s471_s18 = scalar_lea.vmem %s690_s22, 512  ;;  %s561_s24 = smov [#allocation2]  }
  0x3e   : > { %p472_p8 = scmp.ne.s32.totalorder %s690_s22, %s471_s18  ;;  %s476_s25 = sshll.u32 %s561_s24, 4  ;;  %s477_s25 = int_to_ptr.vmem [resolvable:$false] %s476_s25 }
  0x3f   : > { %s478_s26 = scalar_lea.vmem %s477_s25, 1024  ;;  %p479_p3 = scmp.lt.s32.totalorder %s690_s22, %s477_s25 }
  0x40   : > { %p474_p10 = pnand %p472_p8, %p458_p0  ;;  %p480_p7 = scmp.lt.s32.totalorder %s478_s26, %s471_s18 }
  0x42   : > { %p475_p13 = pneg %p474_p10  ;;  %p481_p9 = por %p480_p7, %p479_p3 }
  0x44   : > { %p482_p1 = pnand %p481_p9, %p475_p13 }
  0x46   : > { %485 = shalt.err (!%p482_p1)
}
  0x47   : > { %373 = dma.hbm_to_vmem [thread:$0]  (!%p686_p11), %s684_s27, 512, %s690_s22, %s692_s28, %s559_s4, %s559_s4, %s560_s5  }
  0x48   : > { %p805_p0 = scmp.ne.s32.totalorder %s800_s17, 0 }
  0x49   : > { %s726_s19 = sand.u32 (!%p805_p0), 1, %s548_s10   ;;  %p806_p5 = scmp.ne.s32.totalorder (!%p805_p0), %s798_s15, 0 }
  0x4a   : > { %146 = sbr.rel (%p805_p0) target bundleno = 412 (0x19c), region = 28  ;;  %s348_s29 = sshll.u32 (!%p805_p0), %s726_s19, 5 }
  0x4b   : > { %s149_s30 = scalar_lea.sflag (!%p805_p0), [#allocation3], %s726_s19  ;;  %s152_s23 = scalar_lea.vmem (!%p805_p0), [#allocation2], %s348_s29 }
  0x51   : > { %531 = dma.done.wait (%p806_p5), %s149_s30, 512  }
  0x52   : > { %533 = vsyncadd (%p806_p5), %s149_s30, 4294966784  ;;  %p807_p11 = scmp.eq.s32.totalorder %s602_s13, 0 }
  0x54   : > { %535 = dma.done.wait (%p807_p11), [#allocation6], 512   ;;  %p808_p2 = pmov %p807_p11 }
  0x55   : > { %v179_v0 = vld [vmem:[%s152_s23] sm:$0xff]  ;;  %v181_v1 = vld [vmem:[%s152_s23 + $0x10] sm:$0xff]  ;;  %v180_v2 = vld [vmem:[%s152_s23 + $0x8] sm:$0xff]  ;;  %v562_v4 = vmov 0.0   ;;  %s176_s15 = scalar_lea.vmem [#allocation7], %s348_s29  ;;  %s357_s17 = sshll.u32 %s602_s13, 9 }
  0x56   : > { %537 = vsyncadd (%p808_p2), [#allocation6], 4294966784  ;;  %vm183_vm0 = vcmp.ne.f32.partialorder %v179_v0, 0.0  ;;  %vm185_vm1 = vcmp.ne.f32.partialorder %v181_v1, 0.0  ;;  %vm184_vm2 = vcmp.ne.f32.partialorder %v180_v2, 0.0  ;;  %v182_v3 = vld [vmem:[%s152_s23 + $0x18] sm:$0xff]  ;;  %s746_s22 = scalar_lea.hbm %s794_s2, %s357_s17 }
  0x57   : > { %v187_v5 = vsel %vm183_vm0, 1.0, %v562_v4  ;;  %v189_v6 = vsel %vm185_vm1, 1.0, %v562_v4  ;;  %vm186_vm3 = vcmp.ne.f32.partialorder %v182_v3, 0.0  ;;  %v188_v7 = vsel %vm184_vm2, 1.0, %v562_v4  ;;  %v203_v9 = vld [vmem:[#allocation5] sm:$0xff]  ;;  %v205_v10 = vld [vmem:[#allocation5 + $0x10] sm:$0xff] }
  0x58   : > { %191 = vmax.xlane.f32.xlu0 %v187_v5  ;;  %195 = vmax.xlane.f32.xlu1 %v189_v6  ;;  %v190_v8 = vsel %vm186_vm3, 1.0, %v562_v4  ;;  %v204_v16 = vld [vmem:[#allocation5 + $0x8] sm:$0xff]  ;;  %v206_v17 = vld [vmem:[#allocation5 + $0x18] sm:$0xff]  ;;  %s257_s4 = sshll.u32 %s176_s15, 4  ;;  %s244_s28 = scalar_lea.sflag [#allocation4], %s726_s19  ;;  %s748_s4 = int_to_ptr.vmem [resolvable:$true] %s257_s4 }
  0x59   : > { %s486_s3 = scalar_lea.vmem %s748_s4, 512  ;;  %s563_s13 = smov [#allocation7]  }
  0x5a   : > { %p487_p4 = scmp.ne.s32.totalorder %s748_s4, %s486_s3  ;;  %s490_s6 = sshll.u32 %s563_s13, 4  ;;  %s491_s6 = int_to_ptr.vmem [resolvable:$false] %s490_s6 }
  0x5b   : > { %s492_s7 = scalar_lea.vmem %s491_s6, 1024  ;;  %p493_p10 = scmp.lt.s32.totalorder %s748_s4, %s491_s6 }
  0x5c   : > { %193 = vmax.xlane.f32.xlu0 %v188_v7  ;;  %197 = vmax.xlane.f32.xlu1 %v190_v8  ;;  %p488_p6 = pnand %p487_p4, %p675_p12  ;;  %p494_p13 = scmp.lt.s32.totalorder %s492_s7, %s486_s3 }
  0x5e   : > { %p489_p8 = pneg %p488_p6  ;;  %p495_p3 = por %p494_p13, %p493_p10 }
  0x60   : > { %p496_p7 = pnand %p495_p3, %p489_p8 }
  0xe5   : > { %v192_v11 = vpop.xlane.xlu0 %191  ;;  %v196_v12 = vpop.xlane.xlu1 %195 }
  0xe6   : > { %vm199_vm4 = vcmp.gt.f32.partialorder %v192_v11, 0.0  ;;  %vm201_vm5 = vcmp.gt.f32.partialorder %v196_v12, 0.0 }
  0xe7   : > { %v215_v13 = vsel %vm199_vm4, %v179_v0, %v203_v9  ;;  %v217_v14 = vsel %vm201_vm5, %v181_v1, %v205_v10 }
  0xe8   : > { %v219_v15 = vmul.f32 %v215_v13, %v215_v13  ;;  %v221_v20 = vmul.f32 %v217_v14, %v217_v14 }
  0xe9   : > { %v194_v18 = vpop.xlane.xlu0 %193  ;;  %v198_v19 = vpop.xlane.xlu1 %197 }
  0xea   : > { %vm200_vm6 = vcmp.gt.f32.partialorder %v194_v18, 0.0  ;;  %223 = vadd.xlane.f32.xlu0 %v219_v15  ;;  %vm202_vm7 = vcmp.gt.f32.partialorder %v198_v19, 0.0 }
  0xeb   : > { %v216_v21 = vsel %vm200_vm6, %v180_v2, %v204_v16  ;;  %v218_v22 = vsel %vm202_vm7, %v182_v3, %v206_v17 }
  0xec   : > { %v220_v23 = vmul.f32 %v216_v21, %v216_v21  ;;  %v222_v24 = vmul.f32 %v218_v22, %v218_v22 }
  0xee   : > { %227 = vadd.xlane.f32.xlu0 %v221_v20  ;;  %225 = vadd.xlane.f32.xlu1 %v220_v23 }
  0xf2   : > { %229 = vadd.xlane.f32.xlu1 %v222_v24 }
 0x177   : > { %v224_v25 = vpop.xlane.xlu0 %223 }
 0x178   : > { %420 = vrsqrt.f32 %v224_v25 }
 0x17b   : > { %v226_v26 = vpop.xlane.xlu1 %225  ;;  %v228_v27 = vpop.xlane.xlu0 %227 }
 0x17c   : > { %422 = vrsqrt.f32 %v226_v26 }
 0x17d   : > { %424 = vrsqrt.f32 %v228_v27 }
 0x17f   : > { %v230_v28 = vpop.xlane.xlu1 %229 }
 0x180   : > { %426 = vrsqrt.f32 %v230_v28 }
 0x182   : > { %v421_v29 = vpop.eup %420 }
 0x183   : > { %v235_v30 = vmul.f32 %v421_v29, %v215_v13 }
 0x185   : > { %239 = vst [vmem:[%s176_s15] sm:$0xff] %v235_v30 }
 0x186   : > { %v423_v31 = vpop.eup %422 }
 0x187   : > { %v425_v32 = vpop.eup %424  ;;  %v236_v33 = vmul.f32 %v423_v31, %v216_v21 }
 0x188   : > { %v237_v34 = vmul.f32 %v425_v32, %v217_v14 }
 0x189   : > { %240 = vst [vmem:[%s176_s15 + $0x8] sm:$0xff] %v236_v33 }
 0x18a   : > { %v427_v35 = vpop.eup %426  ;;  %241 = vst [vmem:[%s176_s15 + $0x10] sm:$0xff] %v237_v34 }
 0x18b   : > { %v238_v36 = vmul.f32 %v427_v35, %v218_v22 }
 0x18d   : > { %242 = vst [vmem:[%s176_s15 + $0x18] sm:$0xff] %v238_v36 }
 0x18e   : > { %499 = shalt.err (!%p496_p7)
}
 0x18f   : > { %s500_s20 = scalar_lea.hbm %s746_s22, 512  ;;  %s504_s25 = scalar_lea.hbm %s794_s2, 1024 }
 0x190   : > { %p501_p9 = scmp.ne.s32.totalorder %s746_s22, %s500_s20  ;;  %p505_p5 = scmp.lt.u32.totalorder %s746_s22, %s794_s2 }
 0x191   : > { %p506_p11 = scmp.lt.u32.totalorder %s504_s25, %s500_s20  ;;  %p508_p4 = scmp.lt.u32.totalorder %s500_s20, %s746_s22 }
 0x192   : > { %p502_p1 = pnand %p501_p9, %p675_p12 }
 0x193   : > { %p507_p2 = por %p506_p11, %p505_p5 }
 0x194   : > { %p503_p0 = pneg %p502_p1 }
 0x195   : > { %p509_p6 = por %p508_p4, %p507_p2 }
 0x197   : > { %p510_p8 = pnand %p509_p6, %p503_p0 }
 0x199   : > { %513 = shalt.err (!%p510_p8)
}
 0x19a   : > { %s564_s30 = smov 128   ;;  %s565_s23 = smov 8  }
 0x19b   : > { %364 = dma.vmem_to_hbm [thread:$0]  (%p675_p12), %s748_s4, 512, %s746_s22, %s244_s28, %s564_s30, %s564_s30, %s565_s23  }
 0x19c PF: > { %s272_s15 = sand.u32 1, %s544_s9   ;;  %p809_p10 = scmp.ne.s32.totalorder %s799_s16, 0 }
 0x19d   : > { %p810_p13 = scmp.ge.s32.totalorder %s556_s12, 2  ;;  %s273_s17 = scalar_lea.sflag [#allocation4], %s272_s15 }
 0x19f   : > { %p375_p3 = pnand %p810_p13, %p809_p10 }
 0x1a1   : > { %539 = dma.done.wait (!%p375_p3), %s273_s17, 512  }
 0x1a2   : > { %541 = vsyncadd (!%p375_p3), %s273_s17, 4294966784  ;;  %p16_p7 = scmp.ge.s32.totalorder %s637_s21, 4   ;;  %s811_s9 = smov %s548_s10 }
 0x1a3   : > { %s812_s10 = smov %s552_s11  ;;  %s813_s11 = smov %s671_s8 }
 0x1a4   : > { %s814_s12 = smov %s637_s21  ;;  %18 = sbr.rel (!%p16_p7) target bundleno = 6 (0x6), region = 77 }
 0x1ab   :  { %278 = vsyncpa [#allocation3], 1 }
 0x1ac   :  { %280 = vsyncpa [#allocation3 + $0x1], 1 }
 0x1ad   :  { %281 = vsyncpa [#allocation6], 1 }
 0x1ae   :  { %282 = vsyncpa [#allocation4], 1 }
 0x1af   :  { %284 = vsyncpa [#allocation4 + $0x1], 1 }

</bundles_post_ra>
